<compile_context>
chip_gen: v5e
topology: v5e:2x2
jax: 0.10.0
libtpu: 0.0.40
codegen_flags: <defaults>
</compile_context>

<pallas_src>
import jax
import jax.numpy as jnp
from jax.experimental import pallas as pl
from jax.experimental.pallas import tpu as pltpu


def encoder_kernel(x_ref, w1_ref, b1_ref, wh_ref, bh_ref, out_ref):
    # x tile -> bf16 (only if it isn't already) so both matmul operands take
    # the native bf16 MXU path.
    x = x_ref[...]
    if x.dtype != jnp.bfloat16:
        x = x.astype(jnp.bfloat16)                                     # [TB, D_in]

    # fc1 + sigmoid, f32 accumulation / activation math (v5e-safe).
    h = jnp.dot(x, w1_ref[...], preferred_element_type=jnp.float32) + b1_ref[...]
    h = jax.nn.sigmoid(h)                                              # [TB, Hpad] f32

    # Fused heads: columns [0, Z) = mu, [Z, 2Z) = log(sigma^2).
    heads = (jnp.dot(h.astype(jnp.bfloat16), wh_ref[...],
                     preferred_element_type=jnp.float32) + bh_ref[...])  # [TB, 2Z]

    # Apply exp(0.5 * .) only to the sigma half via a lane mask (pure VPU/EUP,
    # no cross-lane movement, single lane-dense store). exp on the discarded
    # mu half is free slack on the EUP in this mem-bound kernel.
    z = out_ref.shape[-1] // 2
    col = jax.lax.broadcasted_iota(jnp.int32, heads.shape, dimension=1)
    out = jnp.where(col < z, heads, jnp.exp(0.5 * heads))
    out_ref[...] = out.astype(out_ref.dtype)


def encoder_forward(x, params, *, tile_b=None):
    """x: [B, D_in] float32 or bfloat16 -> (mu [B, Z], sigma [B, Z])."""
    w1, b1, wh, bh = params
    B, d_in = x.shape
    hid = w1.shape[1]            # padded hidden width (multiple of 128)
    two_z = wh.shape[1]
    z = two_z // 2

    # Batch tile: multiple of 8 sublanes, capped at 2048 rows (f32 x-tile
    # double buffers ~= 12.5 MiB). Aim for >= 2 grid steps so the "parallel"
    # batch axis can shard across v7x's two TensorCores.
    if tile_b is None:
        cap = 2048
        target = max(8, ((B + 15) // 16) * 8)     # ~ceil(B/2), rounded up to 8
        tile_b = min(target, cap)
    b_pad = ((B + tile_b - 1) // tile_b) * tile_b
    if b_pad != B:
        x = jnp.pad(x, ((0, b_pad - B), (0, 0)))
    grid = (b_pad // tile_b,)

    flops = 2 * b_pad * (d_in * hid + hid * two_z)
    transcendentals = b_pad * (2 * hid + two_z)   # sigmoid ~2/elem + exp on 2Z lanes
    bytes_accessed = (b_pad * d_in * x.dtype.itemsize          # x
                      + w1.size * w1.dtype.itemsize            # bf16 weights
                      + wh.size * wh.dtype.itemsize
                      + b1.size * 4 + bh.size * 4              # f32 biases
                      + b_pad * two_z * 4)                     # output (f32)

    def resident(shape):
        # VMEM-resident operands (constant index_map): single-buffered.
        return pl.BlockSpec(shape, lambda i: (0, 0),
                            pipeline_mode=pl.Buffered(buffer_count=1))

    out = pl.pallas_call(
        encoder_kernel,
        out_shape=jax.ShapeDtypeStruct((b_pad, two_z), jnp.float32),
        grid_spec=pltpu.PrefetchScalarGridSpec(
            num_scalar_prefetch=0,
            grid=grid,
            in_specs=[
                pl.BlockSpec((tile_b, d_in), lambda i: (i, 0)),   # x: tiled over batch
                resident((d_in, hid)),                            # w1
                resident((1, hid)),                               # b1
                resident((hid, two_z)),                           # fused head weights
                resident((1, two_z)),                             # fused head biases
            ],
            out_specs=pl.BlockSpec((tile_b, two_z), lambda i: (i, 0)),
        ),
        compiler_params=pltpu.CompilerParams(
            dimension_semantics=("parallel",),
            vmem_limit_bytes=40 * 1024 * 1024),
        cost_estimate=pl.CostEstimate(
            flops=flops,
            transcendentals=transcendentals,
            bytes_accessed=bytes_accessed),
    )(x, w1, b1, wh, bh)

    mu = out[:B, :z]
    sigma = out[:B, z:]
    return mu, sigma


def init_params(key, input_dim=784, hidden_dim=200, output_dim=20):
    """PyTorch-Linear-style init U(-1/sqrt(fan_in), 1/sqrt(fan_in)).

    Weights are stored transposed ([in, out]) so the kernel computes x @ W + b,
    the two heads are fused into one [H, 2Z] matrix ([mu | log_sigma^2]), the
    hidden dim is zero-padded to a multiple of 128 (padded wh rows are zeroed
    so sigmoid(0)=0.5 contributes exactly 0), and weights are cast to bf16
    (biases stay f32).
    """
    ks = jax.random.split(key, 6)

    def linear(kw, kb, fan_in, fan_out):
        bound = 1.0 / jnp.sqrt(float(fan_in))
        w = jax.random.uniform(kw, (fan_in, fan_out), jnp.float32, -bound, bound)
        b = jax.random.uniform(kb, (1, fan_out), jnp.float32, -bound, bound)
        return w, b

    w1, b1 = linear(ks[0], ks[1], input_dim, hidden_dim)
    wls, bls = linear(ks[2], ks[3], hidden_dim, output_dim)
    wmu, bmu = linear(ks[4], ks[5], hidden_dim, output_dim)

    wh = jnp.concatenate([wmu, wls], axis=1)   # [H, 2Z]: first Z cols = mu head
    bh = jnp.concatenate([bmu, bls], axis=1)   # [1, 2Z]

    # Lane-align the hidden dim (200 -> 256); result is bit-identical because
    # the padded wh rows are zero.
    hid_pad = ((hidden_dim + 127) // 128) * 128
    if hid_pad != hidden_dim:
        extra = hid_pad - hidden_dim
        w1 = jnp.pad(w1, ((0, 0), (0, extra)))
        b1 = jnp.pad(b1, ((0, 0), (0, extra)))
        wh = jnp.pad(wh, ((0, extra), (0, 0)))

    return (w1.astype(jnp.bfloat16), b1, wh.astype(jnp.bfloat16), bh)


def encoder_ref(x, params):
    """Pure-JAX reference (same bf16-rounded, hidden-padded weights; f32 math)."""
    w1, b1, wh, bh = params
    z = wh.shape[1] // 2
    h = jax.nn.sigmoid(x.astype(jnp.float32) @ w1.astype(jnp.float32) + b1)
    heads = h @ wh.astype(jnp.float32) + bh
    return heads[:, :z], jnp.exp(0.5 * heads[:, z:])


if __name__ == "__main__":
    key = jax.random.PRNGKey(0)
    k_x, k_p = jax.random.split(key)

    B, D_IN, HID, Z = 8, 784, 200, 20
    x = jax.random.normal(k_x, (B, D_IN), jnp.float32)
    params = init_params(k_p, D_IN, HID, Z)

    mu, sigma = jax.block_until_ready(encoder_forward(x, params))
    mu_r, sigma_r = encoder_ref(x, params)

    assert mu.shape == (B, Z) and sigma.shape == (B, Z)
    # bf16 matmul inputs with f32 accumulation -> ~1e-3 abs error budget.
    assert jnp.allclose(mu, mu_r, atol=1e-2, rtol=1e-2)
    assert jnp.allclose(sigma, sigma_r, atol=1e-2, rtol=1e-2)

    # Exercise the ragged-batch / padding path (also hits a 2-step grid).
    x2 = jax.random.normal(k_x, (12, D_IN), jnp.float32)
    mu2, sigma2 = jax.block_until_ready(encoder_forward(x2, params))
    mu2_r, sigma2_r = encoder_ref(x2, params)
    assert mu2.shape == (12, Z) and sigma2.shape == (12, Z)
    assert jnp.allclose(mu2, mu2_r, atol=1e-2, rtol=1e-2)
    assert jnp.allclose(sigma2, sigma2_r, atol=1e-2, rtol=1e-2)

    # bf16-x fast path (upstream producers that already emit bf16).
    mu3, sigma3 = jax.block_until_ready(
        encoder_forward(x.astype(jnp.bfloat16), params))
    assert jnp.allclose(mu3, mu_r, atol=3e-2, rtol=3e-2)
    assert jnp.allclose(sigma3, sigma_r, atol=3e-2, rtol=3e-2)

    print("KERNEL_OK")
</pallas_src>

<mosaic_0001>
module attributes {stable_mosaic.version = 11 : i64} {
  func.func @encoder_kernel(%arg0: i32, %arg1: memref<8x784xf32, #tpu.memory_space<vmem>>, %arg2: memref<784x256xbf16, #tpu.memory_space<vmem>>, %arg3: memref<1x256xf32, #tpu.memory_space<vmem>>, %arg4: memref<256x40xbf16, #tpu.memory_space<vmem>>, %arg5: memref<1x40xf32, #tpu.memory_space<vmem>>, %arg6: memref<8x40xf32, #tpu.memory_space<vmem>>) attributes {dimension_semantics = [#tpu.dimension_semantics<parallel>], iteration_bounds = array<i64: 1>, scalar_prefetch = 0 : i64, scratch_operands = 0 : i64, tpu.core_type = #tpu.core_type<tc>, window_params = [{transform_indices = @transform_0, window_bounds = array<i64: 8, 784>}, {pipeline_mode = #tpu.pipeline_mode<synchronous>, transform_indices = @transform_1, window_bounds = array<i64: 784, 256>}, {pipeline_mode = #tpu.pipeline_mode<synchronous>, transform_indices = @transform_2, window_bounds = array<i64: 1, 256>}, {pipeline_mode = #tpu.pipeline_mode<synchronous>, transform_indices = @transform_3, window_bounds = array<i64: 256, 40>}, {pipeline_mode = #tpu.pipeline_mode<synchronous>, transform_indices = @transform_4, window_bounds = array<i64: 1, 40>}, {transform_indices = @transform_5, window_bounds = array<i64: 8, 40>}]} {
    %c0 = arith.constant 0 : index
    %c0_0 = arith.constant 0 : index
    %0 = vector.load %arg1[%c0, %c0_0] : memref<8x784xf32, #tpu.memory_space<vmem>>, vector<8x784xf32>
    %1 = arith.truncf %0 : vector<8x784xf32> to vector<8x784xbf16>
    %c0_1 = arith.constant 0 : index
    %c0_2 = arith.constant 0 : index
    %2 = vector.load %arg2[%c0_1, %c0_2] : memref<784x256xbf16, #tpu.memory_space<vmem>>, vector<784x256xbf16>
    %cst = arith.constant dense<0.000000e+00> : vector<8x256xf32>
    %3 = tpu.matmul %1, %2, %cst {dimension_numbers = #tpu.dot_dimension_numbers<[1], [0], [0], [1], [0, 0, 1, 1], [], []>} : vector<8x784xbf16>, vector<784x256xbf16>, vector<8x256xf32> -> vector<8x256xf32>
    %c0_3 = arith.constant 0 : index
    %c0_4 = arith.constant 0 : index
    %4 = vector.load %arg3[%c0_3, %c0_4] : memref<1x256xf32, #tpu.memory_space<vmem>>, vector<1x256xf32>
    %5 = vector.broadcast %4 : vector<1x256xf32> to vector<8x256xf32>
    %6 = arith.addf %3, %5 : vector<8x256xf32>
    %7 = arith.negf %6 : vector<8x256xf32>
    %8 = math.exp %7 : vector<8x256xf32>
    %cst_5 = arith.constant 1.000000e+00 : f32
    %9 = vector.broadcast %cst_5 : f32 to vector<8x256xf32>
    %10 = arith.addf %9, %8 : vector<8x256xf32>
    %11 = arith.divf %9, %10 : vector<8x256xf32>
    %12 = arith.truncf %11 : vector<8x256xf32> to vector<8x256xbf16>
    %c0_6 = arith.constant 0 : index
    %c0_7 = arith.constant 0 : index
    %13 = vector.load %arg4[%c0_6, %c0_7] : memref<256x40xbf16, #tpu.memory_space<vmem>>, vector<256x40xbf16>
    %cst_8 = arith.constant dense<0.000000e+00> : vector<8x40xf32>
    %14 = tpu.matmul %12, %13, %cst_8 {dimension_numbers = #tpu.dot_dimension_numbers<[1], [0], [0], [1], [0, 0, 1, 1], [], []>} : vector<8x256xbf16>, vector<256x40xbf16>, vector<8x40xf32> -> vector<8x40xf32>
    %c0_9 = arith.constant 0 : index
    %c0_10 = arith.constant 0 : index
    %15 = vector.load %arg5[%c0_9, %c0_10] : memref<1x40xf32, #tpu.memory_space<vmem>>, vector<1x40xf32>
    %16 = vector.broadcast %15 : vector<1x40xf32> to vector<8x40xf32>
    %17 = arith.addf %14, %16 : vector<8x40xf32>
    %18 = tpu.iota {dimensions = array<i32: 1>} : vector<8x40xi32>
    %c20_i32 = arith.constant 20 : i32
    %19 = vector.broadcast %c20_i32 : i32 to vector<8x40xi32>
    %20 = arith.cmpi slt, %18, %19 : vector<8x40xi32>
    %cst_11 = arith.constant 5.000000e-01 : f32
    %21 = vector.broadcast %cst_11 : f32 to vector<8x40xf32>
    %22 = arith.mulf %21, %17 : vector<8x40xf32>
    %23 = math.exp %22 : vector<8x40xf32>
    %24 = arith.select %20, %17, %23 : vector<8x40xi1>, vector<8x40xf32>
    %c0_12 = arith.constant 0 : index
    %c0_13 = arith.constant 0 : index
    %25 = vector.load %arg6[%c0_12, %c0_13] : memref<8x40xf32, #tpu.memory_space<vmem>>, vector<8x40xf32>
    tpu.vector_store %arg6[%c0_12, %c0_13], %24 {strides = array<i32>} : memref<8x40xf32, #tpu.memory_space<vmem>>, vector<8x40xf32>,
    return
  }
  func.func @transform_0(%arg0: i32) -> (i32, i32) {
    %c0_i32 = arith.constant 0 : i32
    %c0_i32_0 = arith.constant 0 : i32
    return %arg0, %c0_i32 : i32, i32
  }
  func.func @transform_1(%arg0: i32) -> (i32, i32) {
    %c0_i32 = arith.constant 0 : i32
    %c0_i32_0 = arith.constant 0 : i32
    %c0_i32_1 = arith.constant 0 : i32
    return %c0_i32, %c0_i32_0 : i32, i32
  }
  func.func @transform_2(%arg0: i32) -> (i32, i32) {
    %c0_i32 = arith.constant 0 : i32
    %c0_i32_0 = arith.constant 0 : i32
    %c0_i32_1 = arith.constant 0 : i32
    return %c0_i32, %c0_i32_0 : i32, i32
  }
  func.func @transform_3(%arg0: i32) -> (i32, i32) {
    %c0_i32 = arith.constant 0 : i32
    %c0_i32_0 = arith.constant 0 : i32
    %c0_i32_1 = arith.constant 0 : i32
    return %c0_i32, %c0_i32_0 : i32, i32
  }
  func.func @transform_4(%arg0: i32) -> (i32, i32) {
    %c0_i32 = arith.constant 0 : i32
    %c0_i32_0 = arith.constant 0 : i32
    %c0_i32_1 = arith.constant 0 : i32
    return %c0_i32, %c0_i32_0 : i32, i32
  }
  func.func @transform_5(%arg0: i32) -> (i32, i32) {
    %c0_i32 = arith.constant 0 : i32
    %c0_i32_0 = arith.constant 0 : i32
    return %arg0, %c0_i32 : i32, i32
  }
}

</mosaic_0001>

<bundles_post_ra>
// kernel: tpu_custom_call.1
= control target key start
LH: loop header
LB: loop body
LE: loop exit
PB: predicated region body
PF: predicated region fallthrough
CT: control target
= control target key end

     0   :  { %10 = vsyncpa [#allocation3], 0  ;;  %s1842_s0 = inlined_call_operand.vmem [shape: f32[8,784], index: 0, kind: input, shape index: {}]   ;;  %s1843_s1 = inlined_call_operand.hbm [shape: bf16[784,256], index: 1, kind: input, shape index: {}]   ;;  %s1844_s2 = inlined_call_operand.vmem [shape: f32[1,256], index: 2, kind: input, shape index: {}]   ;;  %s1845_s3 = inlined_call_operand.vmem [shape: bf16[256,40], index: 3, kind: input, shape index: {}]   ;;  %s1846_s4 = inlined_call_operand.vmem [shape: f32[1,40], index: 4, kind: input, shape index: {}]   ;;  %s1847_s5 = inlined_call_operand.hbm [shape: f32[8,40], index: 5, kind: output, shape index: {}]  }
   0x1   :  { %11 = vsyncpa [#allocation4], 0  ;;  %s18_s20 = sshll.u32 %s1843_s1, 4  ;;  %s1697_s21 = smov [#allocation2]   ;;  %s19_s20 = int_to_ptr.hbm [resolvable:$true] %s18_s20 }
   0x2   :  { %s20_s22 = sshll.u32 %s1697_s21, 4  ;;  %s1698_s23 = smov 128   ;;  %s21_s22 = int_to_ptr.vmem [resolvable:$true] %s20_s22 }
   0x3   :  { %s1699_s24 = smov 8  }
   0x4   :  { %26 = dma.hbm_to_vmem [thread:$0]  %s19_s20, 12544, %s21_s22, [#allocation3], %s1698_s23, %s1698_s23, %s1699_s24  }
   0x5   :  { %1693 = dma.done.wait [#allocation3], 12544  }
   0x6   :  { %1694 = vsyncadd [#allocation3], 4294954752  ;;  %v1114_v0 = vld [vmem:[#allocation2 + $0x70] sm:$0xf]  ;;  %v1531_v1 = vld [vmem:[#allocation2 + $0x74] sm:$0xf0] }
   0x7   :  { %v1242_v2 = vld [vmem:[#allocation2 + $0x170] sm:$0xf]  ;;  %v1115_v3 = vor.u32 %v1531_v1, %v1114_v0  ;;  %v1563_v4 = vld [vmem:[#allocation2 + $0x174] sm:$0xf0]  ;;  %v1106_v11 = vld [vmem:[#allocation2 + $0x60] sm:$0xf] }
   0x8   :  { %v1306_v5 = vld [vmem:[#allocation2 + $0x1f0] sm:$0xf]  ;;  %v1579_v6 = vld [vmem:[#allocation2 + $0x1f4] sm:$0xf0]  ;;  %v1243_v7 = vor.u32 %v1563_v4, %v1242_v2  ;;  %v1529_v13 = vld [vmem:[#allocation2 + $0x64] sm:$0xf0] }
   0x9   :  { %v1307_v8 = vor.u32 %v1579_v6, %v1306_v5  ;;  %v1178_v9 = vld [vmem:[#allocation2 + $0xf0] sm:$0xf]  ;;  %v1547_v10 = vld [vmem:[#allocation2 + $0xf4] sm:$0xf0]  ;;  %650 = vmatpush.bf16.msra.mxu0 %v1115_v3  ;;  %v1234_v14 = vld [vmem:[#allocation2 + $0x160] sm:$0xf]  ;;  %v1107_v16 = vor.u32 %v1529_v13, %v1106_v11 }
   0xa   :  { %v1179_v12 = vor.u32 %v1547_v10, %v1178_v9  ;;  %v1561_v15 = vld [vmem:[#allocation2 + $0x164] sm:$0xf0]  ;;  %676 = vmatpush.bf16.msra.mxu2 %v1243_v7  ;;  %v1298_v18 = vld [vmem:[#allocation2 + $0x1e0] sm:$0xf]  ;;  %v1098_v23 = vld [vmem:[#allocation2 + $0x50] sm:$0xf] }
   0xb   :  { %689 = vmatpush.bf16.msra.mxu3 %v1307_v8  ;;  %v1235_v17 = vor.u32 %v1561_v15, %v1234_v14  ;;  %v1577_v19 = vld [vmem:[#allocation2 + $0x1e4] sm:$0xf0]  ;;  %v1170_v20 = vld [vmem:[#allocation2 + $0xe0] sm:$0xf]  ;;  %v1527_v24 = vld [vmem:[#allocation2 + $0x54] sm:$0xf0] }
   0xc   :  { %663 = vmatpush.bf16.msra.mxu1 %v1179_v12  ;;  %v1299_v21 = vor.u32 %v1577_v19, %v1298_v18  ;;  %v1545_v22 = vld [vmem:[#allocation2 + $0xe4] sm:$0xf0]  ;;  %v1226_v26 = vld [vmem:[#allocation2 + $0x150] sm:$0xf]  ;;  %v1559_v27 = vld [vmem:[#allocation2 + $0x154] sm:$0xf0]  ;;  %v1099_v29 = vor.u32 %v1527_v24, %v1098_v23 }
   0xd   :  { %v1171_v25 = vor.u32 %v1545_v22, %v1170_v20  ;;  %v1290_v28 = vld [vmem:[#allocation2 + $0x1d0] sm:$0xf]  ;;  %651 = vmatpush.bf16.msra.mxu0 %v1107_v16  ;;  %v1575_v30 = vld [vmem:[#allocation2 + $0x1d4] sm:$0xf0]  ;;  %v1227_v33 = vor.u32 %v1559_v27, %v1226_v26  ;;  %v1090_v35 = vld [vmem:[#allocation2 + $0x40] sm:$0xf] }
   0xe   :  { %v1162_v31 = vld [vmem:[#allocation2 + $0xd0] sm:$0xf]  ;;  %v1543_v32 = vld [vmem:[#allocation2 + $0xd4] sm:$0xf0]  ;;  %677 = vmatpush.bf16.msra.mxu2 %v1235_v17  ;;  %v1291_v34 = vor.u32 %v1575_v30, %v1290_v28  ;;  %v1525_v36 = vld [vmem:[#allocation2 + $0x44] sm:$0xf0] }
   0xf   :  { %690 = vmatpush.bf16.msra.mxu3 %v1299_v21  ;;  %v1218_v37 = vld [vmem:[#allocation2 + $0x140] sm:$0xf]  ;;  %v1163_v38 = vor.u32 %v1543_v32, %v1162_v31  ;;  %v1557_v39 = vld [vmem:[#allocation2 + $0x144] sm:$0xf0]  ;;  %v1091_v44 = vor.u32 %v1525_v36, %v1090_v35  ;;  %v1082_v47 = vld [vmem:[#allocation2 + $0x30] sm:$0xf] }
  0x10   :  { %664 = vmatpush.bf16.msra.mxu1 %v1171_v25  ;;  %v1282_v40 = vld [vmem:[#allocation2 + $0x1c0] sm:$0xf]  ;;  %v1573_v41 = vld [vmem:[#allocation2 + $0x1c4] sm:$0xf0]  ;;  %v1219_v45 = vor.u32 %v1557_v39, %v1218_v37  ;;  %v1523_v48 = vld [vmem:[#allocation2 + $0x34] sm:$0xf0] }
  0x11   :  { %v1154_v42 = vld [vmem:[#allocation2 + $0xc0] sm:$0xf]  ;;  %v1541_v43 = vld [vmem:[#allocation2 + $0xc4] sm:$0xf0]  ;;  %652 = vmatpush.bf16.msra.mxu0 %v1099_v29  ;;  %v1283_v46 = vor.u32 %v1573_v41, %v1282_v40  ;;  %v1210_v49 = vld [vmem:[#allocation2 + $0x130] sm:$0xf]  ;;  %v1083_v56 = vor.u32 %v1523_v48, %v1082_v47 }
  0x12   :  { %678 = vmatpush.bf16.msra.mxu2 %v1227_v33  ;;  %v1155_v50 = vor.u32 %v1541_v43, %v1154_v42  ;;  %v1555_v51 = vld [vmem:[#allocation2 + $0x134] sm:$0xf0]  ;;  %v1274_v52 = vld [vmem:[#allocation2 + $0x1b0] sm:$0xf]  ;;  %v1074_v59 = vld [vmem:[#allocation2 + $0x20] sm:$0xf] }
  0x13   :  { %691 = vmatpush.bf16.msra.mxu3 %v1291_v34  ;;  %v1571_v53 = vld [vmem:[#allocation2 + $0x1b4] sm:$0xf0]  ;;  %v1146_v54 = vld [vmem:[#allocation2 + $0xb0] sm:$0xf]  ;;  %v1211_v57 = vor.u32 %v1555_v51, %v1210_v49  ;;  %v1521_v60 = vld [vmem:[#allocation2 + $0x24] sm:$0xf0] }
  0x14   :  { %665 = vmatpush.bf16.msra.mxu1 %v1163_v38  ;;  %v1539_v55 = vld [vmem:[#allocation2 + $0xb4] sm:$0xf0]  ;;  %v1275_v58 = vor.u32 %v1571_v53, %v1274_v52  ;;  %v1202_v61 = vld [vmem:[#allocation2 + $0x120] sm:$0xf]  ;;  %v1553_v63 = vld [vmem:[#allocation2 + $0x124] sm:$0xf0]  ;;  %v1075_v4 = vor.u32 %v1521_v60, %v1074_v59 }
  0x15   :  { %653 = vmatpush.bf16.msra.mxu0 %v1091_v44  ;;  %v1147_v62 = vor.u32 %v1539_v55, %v1146_v54  ;;  %v1266_v0 = vld [vmem:[#allocation2 + $0x1a0] sm:$0xf]  ;;  %v1569_v1 = vld [vmem:[#allocation2 + $0x1a4] sm:$0xf0]  ;;  %v1203_v5 = vor.u32 %v1553_v63, %v1202_v61  ;;  %v1066_v7 = vld [vmem:[#allocation2 + $0x10] sm:$0xf] }
  0x16   :  { %679 = vmatpush.bf16.msra.mxu2 %v1219_v45  ;;  %v1138_v2 = vld [vmem:[#allocation2 + $0xa0] sm:$0xf]  ;;  %v1537_v3 = vld [vmem:[#allocation2 + $0xa4] sm:$0xf0]  ;;  %v1267_v6 = vor.u32 %v1569_v1, %v1266_v0  ;;  %v1519_v8 = vld [vmem:[#allocation2 + $0x14] sm:$0xf0] }
  0x17   :  { %692 = vmatpush.bf16.msra.mxu3 %v1283_v46  ;;  %v1194_v9 = vld [vmem:[#allocation2 + $0x110] sm:$0xf]  ;;  %v1139_v10 = vor.u32 %v1537_v3, %v1138_v2  ;;  %v1551_v11 = vld [vmem:[#allocation2 + $0x114] sm:$0xf0]  ;;  %v1067_v16 = vor.u32 %v1519_v8, %v1066_v7  ;;  %v1058_v17 = vld [vmem:[#allocation2] sm:$0xf] }
  0x18   :  { %666 = vmatpush.bf16.msra.mxu1 %v1155_v50  ;;  %v1258_v12 = vld [vmem:[#allocation2 + $0x190] sm:$0xf]  ;;  %v1567_v13 = vld [vmem:[#allocation2 + $0x194] sm:$0xf0]  ;;  %v1517_v18 = vld [vmem:[#allocation2 + $0x4] sm:$0xf0]  ;;  %v1195_v20 = vor.u32 %v1551_v11, %v1194_v9 }
  0x19   :  { %654 = vmatpush.bf16.msra.mxu0 %v1083_v56  ;;  %v1130_v14 = vld [vmem:[#allocation2 + $0x90] sm:$0xf]  ;;  %v1535_v15 = vld [vmem:[#allocation2 + $0x94] sm:$0xf0]  ;;  %v1186_v19 = vld [vmem:[#allocation2 + $0x100] sm:$0xf]  ;;  %v1259_v21 = vor.u32 %v1567_v13, %v1258_v12  ;;  %v1059_v32 = vor.u32 %v1517_v18, %v1058_v17 }
  0x1a   :  { %680 = vmatpush.bf16.msra.mxu2 %v1211_v57  ;;  %v1549_v22 = vld [vmem:[#allocation2 + $0x104] sm:$0xf0]  ;;  %v1250_v23 = vld [vmem:[#allocation2 + $0x180] sm:$0xf]  ;;  %v1131_v25 = vor.u32 %v1535_v15, %v1130_v14  ;;  %v1370_v26 = vld [vmem:[#allocation2 + $0x270] sm:$0xf] }
  0x1b   :  { %693 = vmatpush.bf16.msra.mxu3 %v1275_v58  ;;  %v1565_v24 = vld [vmem:[#allocation2 + $0x184] sm:$0xf0]  ;;  %v1595_v27 = vld [vmem:[#allocation2 + $0x274] sm:$0xf0]  ;;  %v1530_v28 = vld [vmem:[#allocation2 + $0x74] sm:$0xf]  ;;  %v1187_v36 = vor.u32 %v1549_v22, %v1186_v19 }
  0x1c   :  { %667 = vmatpush.bf16.msra.mxu1 %v1147_v62  ;;  %v1116_v29 = vld [vmem:[#allocation2 + $0x78] sm:$0xf0]  ;;  %v1122_v30 = vld [vmem:[#allocation2 + $0x80] sm:$0xf]  ;;  %v1533_v31 = vld [vmem:[#allocation2 + $0x84] sm:$0xf0]  ;;  %v1251_v37 = vor.u32 %v1565_v24, %v1250_v23  ;;  %v1371_v41 = vor.u32 %v1595_v27, %v1370_v26 }
  0x1d   :  { %655 = vmatpush.bf16.msra.mxu0 %v1075_v4  ;;  %v40_v33 = vld [vmem:[%s1842_s0 + $0x10] sm:$0xff]  ;;  %v1442_v34 = vld [vmem:[#allocation2 + $0x300] sm:$0xf]  ;;  %v1613_v35 = vld [vmem:[#allocation2 + $0x304] sm:$0xf0]  ;;  %v1119_v42 = vor.u32 %v1530_v28, %v1116_v29  ;;  %v1123_v46 = vor.u32 %v1533_v31, %v1122_v30  ;;  %vm646_vm0 = vcmask 130048  }
  0x1e   :  { %681 = vmatpush.bf16.msra.mxu2 %v1203_v5  ;;  %v1434_v38 = vld [vmem:[#allocation2 + $0x2f0] sm:$0xf]  ;;  %v1611_v39 = vld [vmem:[#allocation2 + $0x2f4] sm:$0xf0]  ;;  %v1546_v40 = vld [vmem:[#allocation2 + $0xf4] sm:$0xf]  ;;  %v1443_v47 = vor.u32 %v1613_v35, %v1442_v34  ;;  %v1740_v51 = vpack.c.bf16 %v40_v33, %v40_v33 }
  0x1f   :  { %694 = vmatpush.bf16.msra.mxu3 %v1267_v6  ;;  %v1180_v43 = vld [vmem:[#allocation2 + $0xf8] sm:$0xf0]  ;;  %v1362_v44 = vld [vmem:[#allocation2 + $0x260] sm:$0xf]  ;;  %v1593_v48 = vld [vmem:[#allocation2 + $0x264] sm:$0xf0]  ;;  %v1435_v52 = vor.u32 %v1611_v39, %v1434_v38 }
  0x20   :  { %668 = vmatpush.bf16.msra.mxu1 %v1139_v10  ;;  %v38_v45 = vld [vmem:[%s1842_s0] sm:$0xff]  ;;  %v1108_v50 = vld [vmem:[#allocation2 + $0x68] sm:$0xf0]  ;;  %v41_v53 = vld [vmem:[%s1842_s0 + $0x18] sm:$0xff]  ;;  %v1183_v55 = vor.u32 %v1546_v40, %v1180_v43  ;;  %v1363_v59 = vor.u32 %v1593_v48, %v1362_v44  ;;  %s1700_s19 = smov [#allocation5]   ;;  %s1046_s23 = sshll.u32 %s1847_s5, 4  ;;  %s1047_s23 = int_to_ptr.hbm [resolvable:$true] %s1046_s23 }
  0x21   :  { %656 = vmatpush.bf16.msra.mxu0 %v1067_v16  ;;  %v1528_v49 = vld [vmem:[#allocation2 + $0x64] sm:$0xf]  ;;  %v39_v54 = vld [vmem:[%s1842_s0 + $0x8] sm:$0xff]  ;;  %v1426_v56 = vld [vmem:[#allocation2 + $0x2e0] sm:$0xf]  ;;  %v1748_v58 = vpack.c.bf16 %v38_v45, %v38_v45  ;;  %v1750_v3 = vpack.c.bf16 %v41_v53, %v41_v53  ;;  %s1044_s20 = sshll.u32 %s1700_s19, 4  ;;  %s1045_s20 = int_to_ptr.vmem [resolvable:$true] %s1044_s20 }
  0x22   :  { %682 = vmatpush.bf16.msra.mxu2 %v1195_v20  ;;  %v1609_v57 = vld [vmem:[#allocation2 + $0x2e4] sm:$0xf0]  ;;  %v1111_v60 = vor.u32 %v1528_v49, %v1108_v50  ;;  %v1544_v61 = vld [vmem:[#allocation2 + $0xe4] sm:$0xf]  ;;  %v1172_v62 = vld [vmem:[#allocation2 + $0xe8] sm:$0xf0]  ;;  %v1752_v4 = vpack.c.bf16 %v39_v54, %v39_v54 }
  0x23   :  { %695 = vmatpush.bf16.msra.mxu3 %v1259_v21  ;;  %v1354_v63 = vld [vmem:[#allocation2 + $0x250] sm:$0xf]  ;;  %v1591_v0 = vld [vmem:[#allocation2 + $0x254] sm:$0xf0]  ;;  %v1526_v1 = vld [vmem:[#allocation2 + $0x54] sm:$0xf]  ;;  %v1427_v5 = vor.u32 %v1609_v57, %v1426_v56  ;;  %v1175_v6 = vor.u32 %v1544_v61, %v1172_v62 }
  0x24   :  { %669 = vmatpush.bf16.msra.mxu1 %v1131_v25  ;;  %v1100_v2 = vld [vmem:[#allocation2 + $0x58] sm:$0xf0]  ;;  %v1418_v7 = vld [vmem:[#allocation2 + $0x2d0] sm:$0xf]  ;;  %v1607_v8 = vld [vmem:[#allocation2 + $0x2d4] sm:$0xf0]  ;;  %v1355_v9 = vor.u32 %v1591_v0, %v1354_v63 }
  0x25   :  { %657 = vmatpush.bf16.msra.mxu0 %v1059_v32  ;;  %v1103_v10 = vor.u32 %v1526_v1, %v1100_v2  ;;  %v1542_v11 = vld [vmem:[#allocation2 + $0xd4] sm:$0xf]  ;;  %v1164_v12 = vld [vmem:[#allocation2 + $0xd8] sm:$0xf0]  ;;  %v1346_v13 = vld [vmem:[#allocation2 + $0x240] sm:$0xf]  ;;  %v1419_v17 = vor.u32 %v1607_v8, %v1418_v7 }
  0x26   :  { %683 = vmatpush.bf16.msra.mxu2 %v1187_v36  ;;  %v1589_v14 = vld [vmem:[#allocation2 + $0x244] sm:$0xf0]  ;;  %v1524_v15 = vld [vmem:[#allocation2 + $0x44] sm:$0xf]  ;;  %v1092_v16 = vld [vmem:[#allocation2 + $0x48] sm:$0xf0]  ;;  %v1167_v18 = vor.u32 %v1542_v11, %v1164_v12 }
  0x27   :  { %696 = vmatpush.bf16.msra.mxu3 %v1251_v37  ;;  %v1410_v19 = vld [vmem:[#allocation2 + $0x2c0] sm:$0xf]  ;;  %v1605_v20 = vld [vmem:[#allocation2 + $0x2c4] sm:$0xf0]  ;;  %v1347_v21 = vor.u32 %v1589_v14, %v1346_v13  ;;  %v1095_v22 = vor.u32 %v1524_v15, %v1092_v16  ;;  %v1540_v23 = vld [vmem:[#allocation2 + $0xc4] sm:$0xf] }
  0x28   :  { %670 = vmatpush.bf16.msra.mxu1 %v1123_v46  ;;  %658 = vmatmul.bf16.vlgmr.msra.gmra.mxu0 %v1748_v58  ;;  %v1156_v24 = vld [vmem:[#allocation2 + $0xc8] sm:$0xf0]  ;;  %v1338_v25 = vld [vmem:[#allocation2 + $0x230] sm:$0xf]  ;;  %v1587_v26 = vld [vmem:[#allocation2 + $0x234] sm:$0xf0]  ;;  %v1411_v29 = vor.u32 %v1605_v20, %v1410_v19 }
  0x29   :  { %702 = vmatpush.bf16.msrb.mxu0 %v1371_v41  ;;  %684 = vmatmul.bf16.vlgmr.msra.gmra.mxu2 %v1740_v51  ;;  %v1522_v27 = vld [vmem:[#allocation2 + $0x34] sm:$0xf]  ;;  %v1084_v28 = vld [vmem:[#allocation2 + $0x38] sm:$0xf0]  ;;  %v1159_v30 = vor.u32 %v1540_v23, %v1156_v24  ;;  %v1402_v31 = vld [vmem:[#allocation2 + $0x2b0] sm:$0xf]  ;;  %v1339_v34 = vor.u32 %v1587_v26, %v1338_v25 }
  0x2a   :  { %735 = vmatpush.bf16.msrb.mxu2 %v1443_v47  ;;  %697 = vmatmul.bf16.vlgmr.msra.gmra.mxu3 %v1750_v3  ;;  %v1603_v32 = vld [vmem:[#allocation2 + $0x2b4] sm:$0xf0]  ;;  %v44_v33 = vld [vmem:[%s1842_s0 + $0x30] sm:$0xff]  ;;  %v1087_v35 = vor.u32 %v1522_v27, %v1084_v28  ;;  %v1148_v37 = vld [vmem:[#allocation2 + $0xb8] sm:$0xf0]  ;;  %vm1037_vm10 = vcmask 326656  }
  0x2b   :  { %741 = vmatpush.bf16.msrb.mxu3 %v1119_v42  ;;  %671 = vmatmul.bf16.vlgmr.msra.gmra.mxu1 %v1752_v4  ;;  %v1538_v36 = vld [vmem:[#allocation2 + $0xb4] sm:$0xf]  ;;  %v1330_v38 = vld [vmem:[#allocation2 + $0x220] sm:$0xf]  ;;  %v1585_v39 = vld [vmem:[#allocation2 + $0x224] sm:$0xf0]  ;;  %v1403_v42 = vor.u32 %v1603_v32, %v1402_v31  ;;  %v1761_v43 = vpack.c.bf16 %v44_v33, %v44_v33 }
  0x2c   :  { %715 = vmatpush.bf16.msrb.mxu1 %v1435_v52  ;;  %v1520_v40 = vld [vmem:[#allocation2 + $0x24] sm:$0xf]  ;;  %v1076_v41 = vld [vmem:[#allocation2 + $0x28] sm:$0xf0]  ;;  %v1151_v44 = vor.u32 %v1538_v36, %v1148_v37  ;;  %v1394_v45 = vld [vmem:[#allocation2 + $0x2a0] sm:$0xf]  ;;  %v1331_v47 = vor.u32 %v1585_v39, %v1330_v38 }
  0x2d   :  { %703 = vmatpush.bf16.msrb.mxu0 %v1363_v59  ;;  %v1601_v46 = vld [vmem:[#allocation2 + $0x2a4] sm:$0xf0]  ;;  %v1079_v48 = vor.u32 %v1520_v40, %v1076_v41  ;;  %v1536_v49 = vld [vmem:[#allocation2 + $0xa4] sm:$0xf]  ;;  %v1140_v50 = vld [vmem:[#allocation2 + $0xa8] sm:$0xf0] }
  0x2e   :  { %754 = vmatpush.bf16.msra.mxu2 %v1183_v55  ;;  %v1322_v52 = vld [vmem:[#allocation2 + $0x210] sm:$0xf]  ;;  %v1583_v53 = vld [vmem:[#allocation2 + $0x214] sm:$0xf0]  ;;  %v1518_v54 = vld [vmem:[#allocation2 + $0x14] sm:$0xf]  ;;  %v1395_v56 = vor.u32 %v1601_v46, %v1394_v45  ;;  %v1143_v57 = vor.u32 %v1536_v49, %v1140_v50 }
  0x2f   :  { %742 = vmatpush.bf16.msrb.mxu3 %v1111_v60  ;;  %v1068_v55 = vld [vmem:[#allocation2 + $0x18] sm:$0xf0]  ;;  %v1386_v59 = vld [vmem:[#allocation2 + $0x290] sm:$0xf]  ;;  %v1599_v60 = vld [vmem:[#allocation2 + $0x294] sm:$0xf0]  ;;  %v1323_v62 = vor.u32 %v1583_v53, %v1322_v52 }
  0x30   :  { %716 = vmatpush.bf16.msrb.mxu1 %v1427_v5  ;;  %v1534_v61 = vld [vmem:[#allocation2 + $0x94] sm:$0xf]  ;;  %v1071_v63 = vor.u32 %v1518_v54, %v1068_v55  ;;  %v1132_v0 = vld [vmem:[#allocation2 + $0x98] sm:$0xf0]  ;;  %v1314_v1 = vld [vmem:[#allocation2 + $0x200] sm:$0xf]  ;;  %v1387_v8 = vor.u32 %v1599_v60, %v1386_v59 }
  0x31   :  { %704 = vmatpush.bf16.msrb.mxu0 %v1355_v9  ;;  %v1581_v2 = vld [vmem:[#allocation2 + $0x204] sm:$0xf0]  ;;  %v1516_v5 = vld [vmem:[#allocation2 + $0x4] sm:$0xf]  ;;  %v1562_v7 = vld [vmem:[#allocation2 + $0x174] sm:$0xf]  ;;  %v1135_v12 = vor.u32 %v1534_v61, %v1132_v0 }
  0x32   :  { %755 = vmatpush.bf16.msra.mxu2 %v1175_v6  ;;  %v1060_v6 = vld [vmem:[#allocation2 + $0x8] sm:$0xf0]  ;;  %v1244_v9 = vld [vmem:[#allocation2 + $0x178] sm:$0xf0]  ;;  %v1378_v13 = vld [vmem:[#allocation2 + $0x280] sm:$0xf]  ;;  %v1315_v16 = vor.u32 %v1581_v2, %v1314_v1 }
  0x33   :  { %743 = vmatpush.bf16.msrb.mxu3 %v1103_v10  ;;  %v1594_v10 = vld [vmem:[#allocation2 + $0x274] sm:$0xf]  ;;  %v1372_v11 = vld [vmem:[#allocation2 + $0x278] sm:$0xf0]  ;;  %v1597_v14 = vld [vmem:[#allocation2 + $0x284] sm:$0xf0] }
  0x34   :  { %717 = vmatpush.bf16.msrb.mxu1 %v1419_v17  ;;  %v42_v15 = vld [vmem:[%s1842_s0 + $0x20] sm:$0xff]  ;;  %v1063_v17 = vor.u32 %v1516_v5, %v1060_v6  ;;  %v1124_v19 = vld [vmem:[#allocation2 + $0x88] sm:$0xf0]  ;;  %v1578_v20 = vld [vmem:[#allocation2 + $0x1f4] sm:$0xf]  ;;  %v1379_v26 = vor.u32 %v1597_v14, %v1378_v13 }
  0x35   :  { %705 = vmatpush.bf16.msrb.mxu0 %v1347_v21  ;;  %v1247_v21 = vor.u32 %v1562_v7, %v1244_v9  ;;  %v1308_v23 = vld [vmem:[#allocation2 + $0x1f8] sm:$0xf0]  ;;  %v1610_v24 = vld [vmem:[#allocation2 + $0x2f4] sm:$0xf]  ;;  %v43_v27 = vld [vmem:[%s1842_s0 + $0x28] sm:$0xff] }
  0x36   :  { %756 = vmatpush.bf16.msra.mxu2 %v1167_v18  ;;  %v1532_v18 = vld [vmem:[#allocation2 + $0x84] sm:$0xf]  ;;  %v1436_v25 = vld [vmem:[#allocation2 + $0x2f8] sm:$0xf0]  ;;  %v1364_v33 = vld [vmem:[#allocation2 + $0x268] sm:$0xf0]  ;;  %v1773_v37 = vpack.c.bf16 %v43_v27, %v43_v27 }
  0x37   :  { %744 = vmatpush.bf16.msrb.mxu3 %v1095_v22  ;;  %v1375_v22 = vor.u32 %v1594_v10, %v1372_v11  ;;  %v1560_v28 = vld [vmem:[#allocation2 + $0x164] sm:$0xf]  ;;  %v1127_v31 = vor.u32 %v1532_v18, %v1124_v19  ;;  %v1300_v39 = vld [vmem:[#allocation2 + $0x1e8] sm:$0xf0]  ;;  %v1228_v45 = vld [vmem:[#allocation2 + $0x158] sm:$0xf0] }
  0x38   :  { %718 = vmatpush.bf16.msrb.mxu1 %v1411_v29  ;;  %v1236_v29 = vld [vmem:[#allocation2 + $0x168] sm:$0xf0]  ;;  %v1592_v32 = vld [vmem:[#allocation2 + $0x264] sm:$0xf]  ;;  %v1590_v46 = vld [vmem:[#allocation2 + $0x254] sm:$0xf] }
  0x39   :  { %706 = vmatpush.bf16.msrb.mxu0 %v1339_v34  ;;  %1448 = vmatmul.msk.bf16.vlgmr.msrb.gmra.mxu2 %vm646_vm0, %v1761_v43  ;;  %v1311_v34 = vor.u32 %v1578_v20, %v1308_v23  ;;  %v1576_v36 = vld [vmem:[#allocation2 + $0x1e4] sm:$0xf]  ;;  %v1239_v38 = vor.u32 %v1560_v28, %v1236_v29  ;;  %v1428_v41 = vld [vmem:[#allocation2 + $0x2e8] sm:$0xf0]  ;;  %v1574_v50 = vld [vmem:[#allocation2 + $0x1d4] sm:$0xf] }
  0x3a   :  { %757 = vmatpush.bf16.msra.mxu2 %v1159_v30  ;;  %v1771_v30 = vpack.c.bf16 %v42_v15, %v42_v15  ;;  %v1608_v40 = vld [vmem:[#allocation2 + $0x2e4] sm:$0xf]  ;;  %v1292_v53 = vld [vmem:[#allocation2 + $0x1d8] sm:$0xf0]  ;;  %v1606_v54 = vld [vmem:[#allocation2 + $0x2d4] sm:$0xf] }
  0x3b   :  { %745 = vmatpush.bf16.msrb.mxu3 %v1087_v35  ;;  %v1439_v35 = vor.u32 %v1610_v24, %v1436_v25  ;;  %v1431_v49 = vor.u32 %v1608_v40, %v1428_v41  ;;  %v1420_v55 = vld [vmem:[#allocation2 + $0x2d8] sm:$0xf0]  ;;  %v1220_v59 = vld [vmem:[#allocation2 + $0x148] sm:$0xf0]  ;;  %v1588_v60 = vld [vmem:[#allocation2 + $0x244] sm:$0xf] }
  0x3c   :  { %719 = vmatpush.bf16.msrb.mxu1 %v1403_v42  ;;  %v1367_v42 = vor.u32 %v1592_v32, %v1364_v33  ;;  %v1348_v61 = vld [vmem:[#allocation2 + $0x248] sm:$0xf0]  ;;  %v1572_v0 = vld [vmem:[#allocation2 + $0x1c4] sm:$0xf]  ;;  %v1212_v9 = vld [vmem:[#allocation2 + $0x138] sm:$0xf0] }
  0x3d   :  { %707 = vmatpush.bf16.msrb.mxu0 %v1331_v47  ;;  %v1356_v47 = vld [vmem:[#allocation2 + $0x258] sm:$0xf0]  ;;  %v1284_v2 = vld [vmem:[#allocation2 + $0x1c8] sm:$0xf0]  ;;  %v1604_v5 = vld [vmem:[#allocation2 + $0x2c4] sm:$0xf]  ;;  %v1351_v7 = vor.u32 %v1588_v60, %v1348_v61 }
  0x3e   :  { %758 = vmatpush.bf16.msra.mxu2 %v1151_v44  ;;  %v1558_v44 = vld [vmem:[#allocation2 + $0x154] sm:$0xf]  ;;  %v1412_v6 = vld [vmem:[#allocation2 + $0x2c8] sm:$0xf0]  ;;  %v1287_v11 = vor.u32 %v1572_v0, %v1284_v2  ;;  %v1276_v14 = vld [vmem:[#allocation2 + $0x1b8] sm:$0xf0] }
  0x3f   :  { %746 = vmatpush.bf16.msrb.mxu3 %v1079_v48  ;;  %v1303_v48 = vor.u32 %v1576_v36, %v1300_v39  ;;  %v1231_v52 = vor.u32 %v1558_v44, %v1228_v45  ;;  %v1586_v10 = vld [vmem:[#allocation2 + $0x234] sm:$0xf]  ;;  %v1552_v18 = vld [vmem:[#allocation2 + $0x124] sm:$0xf]  ;;  %v1204_v19 = vld [vmem:[#allocation2 + $0x128] sm:$0xf0] }
  0x40   :  { %720 = vmatpush.bf16.msrb.mxu1 %v1395_v56  ;;  %v1359_v56 = vor.u32 %v1590_v46, %v1356_v47  ;;  %v1602_v15 = vld [vmem:[#allocation2 + $0x2b4] sm:$0xf]  ;;  %v1584_v20 = vld [vmem:[#allocation2 + $0x224] sm:$0xf]  ;;  %v1207_v25 = vor.u32 %v1552_v18, %v1204_v19  ;;  %v1396_v28 = vld [vmem:[#allocation2 + $0x2a8] sm:$0xf0] }
  0x41   :  { %708 = vmatpush.bf16.msrb.mxu0 %v1323_v62  ;;  %v1295_v62 = vor.u32 %v1574_v50, %v1292_v53  ;;  %v1568_v24 = vld [vmem:[#allocation2 + $0x1a4] sm:$0xf]  ;;  %v1196_v32 = vld [vmem:[#allocation2 + $0x118] sm:$0xf0]  ;;  %v1582_v33 = vld [vmem:[#allocation2 + $0x214] sm:$0xf] }
  0x42   :  { %759 = vmatpush.bf16.msra.mxu2 %v1143_v57  ;;  %v1556_v57 = vld [vmem:[#allocation2 + $0x144] sm:$0xf]  ;;  %v1260_v40 = vld [vmem:[#allocation2 + $0x198] sm:$0xf0]  ;;  %v1598_v41 = vld [vmem:[#allocation2 + $0x294] sm:$0xf] }
  0x43   :  { %747 = vmatpush.bf16.msrb.mxu3 %v1071_v63  ;;  %v1423_v63 = vor.u32 %v1606_v54, %v1420_v55  ;;  %v1223_v1 = vor.u32 %v1556_v57, %v1220_v59  ;;  %v1600_v27 = vld [vmem:[#allocation2 + $0x2a4] sm:$0xf]  ;;  %v1188_v46 = vld [vmem:[#allocation2 + $0x108] sm:$0xf0] }
  0x44   :  { %721 = vmatpush.bf16.msrb.mxu1 %v1387_v8  ;;  %v1554_v8 = vld [vmem:[#allocation2 + $0x134] sm:$0xf]  ;;  %v1399_v36 = vor.u32 %v1600_v27, %v1396_v28  ;;  %v1548_v45 = vld [vmem:[#allocation2 + $0x104] sm:$0xf]  ;;  %v1444_v50 = vld [vmem:[#allocation2 + $0x308] sm:$0xf0] }
  0x45   :  { %709 = vmatpush.bf16.msrb.mxu0 %v1315_v16  ;;  %v1215_v13 = vor.u32 %v1554_v8, %v1212_v9  ;;  %v1404_v16 = vld [vmem:[#allocation2 + $0x2b8] sm:$0xf0]  ;;  %v1580_v47 = vld [vmem:[#allocation2 + $0x204] sm:$0xf]  ;;  %v1191_v54 = vor.u32 %v1548_v45, %v1188_v46  ;;  %v1380_v60 = vld [vmem:[#allocation2 + $0x288] sm:$0xf0] }
  0x46   :  { %760 = vmatpush.bf16.msra.mxu2 %v1135_v12  ;;  %v1570_v12 = vld [vmem:[#allocation2 + $0x1b4] sm:$0xf]  ;;  %v1407_v23 = vor.u32 %v1602_v15, %v1404_v16  ;;  %v1564_v55 = vld [vmem:[#allocation2 + $0x184] sm:$0xf]  ;;  %v1615_v15 = vld [vmem:[%s1845_s3 + $0x8] sm:$0xff] }
  0x47   :  { %748 = vmatpush.bf16.msrb.mxu3 %v1063_v17  ;;  %v1596_v59 = vld [vmem:[#allocation2 + $0x284] sm:$0xf] }
  0x48   :  { %722 = vmatpush.bf16.msrb.mxu1 %v1379_v26  ;;  %710 = vmatmul.bf16.vlgmr.msrb.gmra.mxu0 %v1771_v30  ;;  %v1268_v26 = vld [vmem:[#allocation2 + $0x1a8] sm:$0xf0]  ;;  %v1618_v9 = vld [vmem:[%s1845_s3 + $0x20] sm:$0xff] }
  0x49   :  { %767 = vmatpush.bf16.msra.mxu0 %v1247_v21  ;;  %v1332_v21 = vld [vmem:[#allocation2 + $0x228] sm:$0xf0] }
  0x4a   :  { %761 = vmatpush.bf16.msra.mxu2 %v1127_v31  ;;  %749 = vmatmul.bf16.vlgmr.msrb.gmra.mxu3 %v1748_v58  ;;  %v1415_v58 = vor.u32 %v1604_v5, %v1412_v6  ;;  %v1335_v29 = vor.u32 %v1584_v20, %v1332_v21  ;;  %v1550_v31 = vld [vmem:[#allocation2 + $0x114] sm:$0xf]  ;;  %v1614_v20 = vld [vmem:[%s1845_s3] sm:$0xff] }
  0x4b   :  { %793 = vmatpush.bf16.msra.mxu3 %v1375_v22  ;;  %723 = vmatmul.bf16.vlgmr.msrb.gmra.mxu1 %v1773_v37  ;;  %v1279_v22 = vor.u32 %v1570_v12, %v1276_v14  ;;  %v1199_v39 = vor.u32 %v1550_v31, %v1196_v32 }
  0x4c   :  { %780 = vmatpush.bf16.msra.mxu1 %v1311_v34  ;;  %v1324_v34 = vld [vmem:[#allocation2 + $0x218] sm:$0xf0] }
  0x4d   :  { %768 = vmatpush.bf16.msra.mxu0 %v1239_v38  ;;  %762 = vmatmul.bf16.vlgmr.msra.gmra.mxu2 %v1752_v4  ;;  %v1340_v4 = vld [vmem:[#allocation2 + $0x238] sm:$0xf0]  ;;  %v1566_v38 = vld [vmem:[#allocation2 + $0x194] sm:$0xf]  ;;  %v1327_v44 = vor.u32 %v1582_v33, %v1324_v34 }
  0x4e   :  { %806 = vmatpush.bf16.msrb.mxu2 %v1439_v35  ;;  %v1343_v17 = vor.u32 %v1586_v10, %v1340_v4  ;;  %v1271_v35 = vor.u32 %v1568_v24, %v1268_v26 }
  0x4f   :  { %794 = vmatpush.bf16.msra.mxu3 %v1367_v42  ;;  %v1388_v42 = vld [vmem:[#allocation2 + $0x298] sm:$0xf0] }
  0x50   :  { %781 = vmatpush.bf16.msra.mxu1 %v1303_v48  ;;  %v1316_v48 = vld [vmem:[#allocation2 + $0x208] sm:$0xf0]  ;;  %v1391_v53 = vor.u32 %v1598_v41, %v1388_v42  ;;  %v1626_v42 = vld [vmem:[%s1845_s3 + $0x60] sm:$0xff] }
  0x51   :  { %769 = vmatpush.bf16.msra.mxu0 %v1231_v52  ;;  %v1263_v52 = vor.u32 %v1566_v38, %v1260_v40  ;;  %v1319_v57 = vor.u32 %v1580_v47, %v1316_v48  ;;  %v1627_v38 = vld [vmem:[%s1845_s3 + $0x68] sm:$0xff] }
  0x52   :  { %807 = vmatpush.bf16.msrb.mxu2 %v1431_v49  ;;  %v1612_v49 = vld [vmem:[#allocation2 + $0x304] sm:$0xf] }
  0x53   :  { %795 = vmatpush.bf16.msra.mxu3 %v1359_v56  ;;  %v1252_v56 = vld [vmem:[#allocation2 + $0x188] sm:$0xf0]  ;;  %v1447_v61 = vor.u32 %v1612_v49, %v1444_v50  ;;  %v1625_v50 = vld [vmem:[%s1845_s3 + $0x58] sm:$0xff] }
  0x54   :  { %782 = vmatpush.bf16.msra.mxu1 %v1295_v62  ;;  %v1255_v62 = vor.u32 %v1564_v55, %v1252_v56 }
  0x55   :  { %770 = vmatpush.bf16.msra.mxu0 %v1223_v1  ;;  %v1621_v1 = vld [vmem:[%s1845_s3 + $0x38] sm:$0xff] }
  0x56   :  { %808 = vmatpush.bf16.msrb.mxu2 %v1423_v63  ;;  %v1383_v63 = vor.u32 %v1596_v59, %v1380_v60  ;;  %v1624_v59 = vld [vmem:[%s1845_s3 + $0x50] sm:$0xff] }
  0x57   :  { %796 = vmatpush.bf16.msra.mxu3 %v1351_v7 }
  0x58   :  { %783 = vmatpush.bf16.msra.mxu1 %v1287_v11  ;;  %v1617_v11 = vld [vmem:[%s1845_s3 + $0x18] sm:$0xff] }
  0x59   :  { %771 = vmatpush.bf16.msra.mxu0 %v1215_v13  ;;  %v1616_v13 = vld [vmem:[%s1845_s3 + $0x10] sm:$0xff] }
  0x5a   :  { %809 = vmatpush.bf16.msrb.mxu2 %v1415_v58 }
  0x5b   :  { %797 = vmatpush.bf16.msra.mxu3 %v1343_v17 }
  0x5c   :  { %784 = vmatpush.bf16.msra.mxu1 %v1279_v22 }
  0x5d   :  { %772 = vmatpush.bf16.msra.mxu0 %v1207_v25 }
  0x5e   :  { %810 = vmatpush.bf16.msrb.mxu2 %v1407_v23 }
  0x5f   :  { %798 = vmatpush.bf16.msra.mxu3 %v1335_v29  ;;  %v1629_v29 = vld [vmem:[%s1845_s3 + $0x78] sm:$0xff] }
  0x60   :  { %785 = vmatpush.bf16.msra.mxu1 %v1271_v35  ;;  %v1628_v35 = vld [vmem:[%s1845_s3 + $0x70] sm:$0xff] }
  0x61   :  { %773 = vmatpush.bf16.msra.mxu0 %v1199_v39 }
  0x62   :  { %811 = vmatpush.bf16.msrb.mxu2 %v1399_v36 }
  0x63   :  { %799 = vmatpush.bf16.msra.mxu3 %v1327_v44 }
  0x64   :  { %786 = vmatpush.bf16.msra.mxu1 %v1263_v52 }
  0x65   :  { %774 = vmatpush.bf16.msra.mxu0 %v1191_v54 }
  0x66   :  { %812 = vmatpush.bf16.msrb.mxu2 %v1391_v53 }
  0x67   :  { %800 = vmatpush.bf16.msra.mxu3 %v1319_v57 }
  0x68   :  { %787 = vmatpush.bf16.msra.mxu1 %v1255_v62  ;;  %775 = vmatmul.bf16.vlgmr.msra.gmra.mxu0 %v1740_v51  ;;  %v1620_v51 = vld [vmem:[%s1845_s3 + $0x30] sm:$0xff]  ;;  %v1623_v62 = vld [vmem:[%s1845_s3 + $0x48] sm:$0xff] }
  0x69   :  { %826 = vmatpush.bf16.msrb.mxu0 %v1447_v61 }
  0x6a   :  { %801 = vmatmul.bf16.vlgmr.msra.gmra.mxu3 %v1771_v30  ;;  %813 = vmatpush.bf16.msrb.mxu2 %v1383_v63 }
  0x6b   :  { %788 = vmatmul.bf16.vlgmr.msra.gmra.mxu1 %v1750_v3  ;;  %v150_v3 = vld [vmem:[%s1844_s2] sm:$0x3]  ;;  %1017 = vmatpush.bf16.msrb.mxu3 %v1629_v29 }
  0x6c   :  { %1004 = vmatpush.bf16.msrb.mxu1 %v1621_v1  ;;  %v152_v7 = vperm.slane %v150_v3, 0  ;;  %v153_v36 = vperm.slane %v150_v3, 1 }
  0x6d   :  { %814 = vmatmul.bf16.vlgmr.msrb.gmra.mxu2 %v1773_v37 }
  0x6f   :  { %1018 = vmatpush.bf16.msrb.mxu3 %v1628_v35 }
  0x70   :  { %1005 = vmatpush.bf16.msrb.mxu1 %v1620_v51  ;;  %v1622_v51 = vld [vmem:[%s1845_s3 + $0x40] sm:$0xff] }
  0x73   :  { %1019 = vmatpush.bf16.msrb.mxu3 %v1627_v38 }
  0x77   :  { %1020 = vmatpush.bf16.msrb.mxu3 %v1626_v42 }
  0x78   :  { %1449 = vmatmul.msk.bf16.vlgmr.msrb.gmra.mxu0 %vm646_vm0, %v1761_v43  ;;  %v1619_v43 = vld [vmem:[%s1845_s3 + $0x28] sm:$0xff] }
  0x79   :  { %1006 = vmatpush.bf16.msrb.mxu1 %v1619_v43 }
  0x7b   :  { %1021 = vmatpush.bf16.msrb.mxu3 %v1625_v50 }
  0x7d   :  { %1007 = vmatpush.bf16.msrb.mxu1 %v1618_v9 }
  0x7f   :  { %1022 = vmatpush.bf16.msrb.mxu3 %v1624_v59 }
  0x81   :  { %1008 = vmatpush.bf16.msrb.mxu1 %v1617_v11 }
  0x83   :  { %1023 = vmatpush.bf16.msrb.mxu3 %v1623_v62 }
  0x85   :  { %1009 = vmatpush.bf16.msrb.mxu1 %v1616_v13 }
  0x87   :  { %1024 = vmatpush.bf16.msrb.mxu3 %v1622_v51 }
  0x89   :  { %1010 = vmatpush.bf16.msrb.mxu1 %v1615_v15 }
  0x8d   :  { %1011 = vmatpush.bf16.msrb.mxu1 %v1614_v20 }
  0xa5   :  { %v659_v0 = vpop.f32.mrf.mxu0 }
  0xa6   :  { %v660_v10 = vadd.f32 %v659_v0, %v152_v7 }
  0xa8   :  { %v672_v2 = vpop.f32.mrf.mxu1 }
  0xa9   :  { %v673_v58 = vadd.f32 %v672_v2, %v660_v10 }
  0xac   :  { %v685_v5 = vpop.f32.mrf.mxu2 }
  0xad   :  { %v698_v30 = vpop.f32.mrf.mxu3  ;;  %v661_v37 = vpop.f32.mrf.mxu0  ;;  %v686_v14 = vadd.f32 %v685_v5, %v673_v58 }
  0xaf   :  { %v699_v16 = vadd.f32 %v698_v30, %v686_v14 }
  0xb0   :  { %v674_v6 = vpop.f32.mrf.mxu1 }
  0xb4   :  { %v687_v8 = vpop.f32.mrf.mxu2 }
  0xb5   :  { %v700_v4 = vpop.f32.mrf.mxu3 }
  0xbc   :  { %v737_v12 = vpop.f32.mrf.mxu2 }
  0xc4   :  { %v739_v19 = vpop.f32.mrf.mxu2 }
  0xc5   :  { %v711_v17 = vpop.f32.mrf.mxu0 }
  0xc6   :  { %v712_v18 = vadd.f32 %v711_v17, %v699_v16 }
  0xc8   :  { %v724_v21 = vpop.f32.mrf.mxu1 }
  0xc9   :  { %v725_v22 = vadd.f32 %v724_v21, %v712_v18 }
  0xcb   :  { %v738_v23 = vadd.f32 %v737_v12, %v725_v22  ;;  %v1634_v22 = vld [vmem:[%s1846_s4] ss:$0 sm:$0xff] }
  0xcd   :  { %v1450_v24 = vmul.f32 -1.442695, %v738_v23  ;;  %v713_v25 = vpop.f32.mrf.mxu0  ;;  %v750_v27 = vpop.f32.mrf.mxu3 }
  0xce   :  { %v751_v41 = vadd.f32 %v750_v27, %v153_v36 }
  0xcf   :  { %1635 = vpow2.f32 %v1450_v24 }
  0xd0   :  { %v763_v26 = vpop.f32.mrf.mxu2  ;;  %v726_v28 = vpop.f32.mrf.mxu1 }
  0xd1   :  { %v764_v49 = vadd.f32 %v763_v26, %v751_v41  ;;  %v1030_v26 = vlaneseq }
  0xd3   :  { %v1031_v29 = vand.u32 127, %v1030_v26 }
  0xd5   :  { %v1636_v31 = vpop.eup %1635  ;;  %v752_v34 = vpop.f32.mrf.mxu3  ;;  %vm1032_vm9 = vcmp.lt.s32.totalorder %v1031_v29, 20 }
  0xd6   :  { %v838_v32 = vadd.f32 1.0, %v1636_v31 }
  0xd8   :  { %v765_v33 = vpop.f32.mrf.mxu2  ;;  %1637 = vrcp.f32 %v838_v32  ;;  %v851_v45 = vand.u32 2147483648, %v838_v32  ;;  %v849_v48 = vand.u32 2147483647, %v838_v32  ;;  %vm845_vm2 = vweird.f32 %v838_v32 }
  0xda   :  { %v852_v54 = vor.u32 1.1754944e-38, %v851_v45  ;;  %vm850_vm4 = vcmp.eq.f32.partialorder %v849_v48, 8.507059e+37 }
  0xde   :  { %v1638_v39 = vpop.eup %1637 }
  0xdf   :  { %v841_v40 = vmul.f32 %v1638_v39, %v838_v32  ;;  %vm846_vm1 = vweird.f32 %v1638_v39 }
  0xe0   :  { %vm847_vm3 = vmor %vm845_vm2, %vm846_vm1 }
  0xe1   :  { %v842_v44 = vsub.f32 1.0, %v841_v40 }
  0xe3   :  { %v843_v47 = vmul.f32 %v1638_v39, %v842_v44 }
  0xe5   :  { %v776_v46 = vpop.f32.mrf.mxu0  ;;  %v844_v52 = vadd.f32 %v1638_v39, %v843_v47 }
  0xe6   :  { %v777_v56 = vadd.f32 %v776_v46, %v764_v49 }
  0xe7   :  { %v848_v55 = vsel %vm847_vm3, %v1638_v39, %v844_v52 }
  0xe8   :  { %v789_v53 = vpop.f32.mrf.mxu1  ;;  %v853_v57 = vsel %vm850_vm4, %v852_v54, %v848_v55 }
  0xe9   :  { %v870_v60 = vpack.c.bf16 %v853_v57, %v853_v57  ;;  %v790_v0 = vadd.f32 %v789_v53, %v777_v56 }
  0xeb   :  { %1012 = vmatmul.bf16.vlgmr.msrb.gmra.mxu1 %v870_v60 }
  0xed   :  { %v802_v61 = vpop.f32.mrf.mxu3  ;;  %v778_v63 = vpop.f32.mrf.mxu0 }
  0xee   :  { %v803_v2 = vadd.f32 %v802_v61, %v790_v0 }
  0xf0   :  { %v815_v1 = vpop.f32.mrf.mxu2  ;;  %v791_v5 = vpop.f32.mrf.mxu1 }
  0xf1   :  { %v816_v3 = vadd.f32 %v815_v1, %v803_v2 }
  0xf5   :  { %v804_v30 = vpop.f32.mrf.mxu3  ;;  %v828_v37 = vpop.f32.mrf.mxu0 }
  0xf6   :  { %v829_v43 = vadd.f32 %v828_v37, %v816_v3 }
  0xf8   :  { %v817_v6 = vpop.f32.mrf.mxu2  ;;  %v1451_v7 = vmul.f32 -1.442695, %v829_v43 }
  0xfa   :  { %1639 = vpow2.f32 %v1451_v7 }
  0xfd   :  { %v830_v8 = vpop.f32.mrf.mxu0 }
 0x100   :  { %v1640_v9 = vpop.eup %1639 }
 0x101   :  { %v839_v10 = vadd.f32 1.0, %v1640_v9 }
 0x103   :  { %1641 = vrcp.f32 %v839_v10  ;;  %v866_v12 = vand.u32 2147483648, %v839_v10  ;;  %v864_v14 = vand.u32 2147483647, %v839_v10  ;;  %vm860_vm6 = vweird.f32 %v839_v10 }
 0x105   :  { %v867_v16 = vor.u32 1.1754944e-38, %v866_v12  ;;  %vm865_vm8 = vcmp.eq.f32.partialorder %v864_v14, 8.507059e+37 }
 0x109   :  { %v1642_v4 = vpop.eup %1641 }
 0x10a   :  { %v856_v11 = vmul.f32 %v1642_v4, %v839_v10  ;;  %vm861_vm5 = vweird.f32 %v1642_v4 }
 0x10b   :  { %vm862_vm7 = vmor %vm860_vm6, %vm861_vm5 }
 0x10c   :  { %v857_v58 = vsub.f32 1.0, %v856_v11 }
 0x10e   :  { %v858_v13 = vmul.f32 %v1642_v4, %v857_v58 }
 0x110   :  { %v859_v15 = vadd.f32 %v1642_v4, %v858_v13 }
 0x112   :  { %v863_v17 = vsel %vm862_vm7, %v1642_v4, %v859_v15 }
 0x113   :  { %v868_v18 = vsel %vm865_vm8, %v867_v16, %v863_v17 }
 0x114   :  { %v871_v19 = vpack.c.bf16 %v868_v18, %v868_v18 }
 0x116   :  { %1025 = vmatmul.bf16.vlgmr.msrb.gmra.mxu3 %v871_v19 }
 0x168   :  { %v1013_v20 = vpop.f32.mrf.mxu1 }
 0x169   :  { %v1014_v23 = vadd.f32 %v1634_v22, %v1013_v20 }
 0x170   :  { %v1015_v21 = vpop.f32.mrf.mxu1 }
 0x199   :  { %v1026_v24 = vpop.f32.mrf.mxu3 }
 0x19a   :  { %v1027_v25 = vadd.f32 %v1026_v24, %v1014_v23 }
 0x19c   :  { %v1033_v27 = vmul.f32 0.5, %v1027_v25 }
 0x19e   :  { %v1034_v28 = vmul.f32 1.442695, %v1033_v27 }
 0x1a0   :  { %1643 = vpow2.f32 %v1034_v28 }
 0x1a1   :  { %v1028_v31 = vpop.f32.mrf.mxu3 }
 0x1a6   :  { %v1644_v32 = vpop.eup %1643 }
 0x1a7   :  { %v1036_v33 = vsel %vm1032_vm9, %v1027_v25, %v1644_v32 }
 0x1a8   :  { %1038 = vst.msk [vmem:[#allocation5] sm:$0xff] %vm1037_vm10, %v1036_v33 }
 0x1a9   :  { %1049 = dma.vmem_to_hbm [thread:$0]  %s1045_s20, 128, %s1047_s23, [#allocation4]  }
 0x1aa   :  { %1695 = dma.done.wait [#allocation4], 128  }
 0x1ab   :  { %1696 = vsyncadd [#allocation4], 4294967168 }
 0x1ac   :  { %1054 = vsyncpa [#allocation3], 1 }
 0x1ad   :  { %1055 = vsyncpa [#allocation4], 1 }

</bundles_post_ra>
